<compile_context>
chip_gen: v6e
topology: v6e:2x2x1
jax: 0.10.0
libtpu: 0.0.40
codegen_flags: <defaults>
</compile_context>

<pallas_src>
import math

import jax
import jax.numpy as jnp
from jax.experimental import pallas as pl
from jax.experimental.pallas import tpu as pltpu


def _token_embedding_kernel(x_ref, w_ref, o_ref):
    # x_ref: (bt, L, C)   w_ref: (3*C, dt)   o_ref: (bt, L, dt)
    bt, L, C = x_ref.shape
    dt = w_ref.shape[1]

    x = x_ref[...]                                   # (bt, L, C)

    # Circular taps for kernel_size=3 / circular padding=1: whole-block shifts
    # along the time axis (one op per tap, independent of b_tile).
    #   prev[:, t] = x[:, (t-1) % L],  next[:, t] = x[:, (t+1) % L]
    # jnp.roll lowers to two sublane slices + a concat; pltpu.roll(axis=1) would
    # move this onto the XLU rotate slot, but the kernel is memory-bound so the
    # difference is immaterial.
    x_prev = jnp.roll(x, shift=1, axis=1)
    x_next = jnp.roll(x, shift=-1, axis=1)

    # im2col: ONE channel-axis concat -> (bt, L, 3C).  Channel order
    # [prev, cur, next] matches the flattened weight row layout k*C + c.
    xs3 = jnp.concatenate([x_prev, x, x_next], axis=-1)

    # Single fused MXU matmul with K = 3C, f32 accumulation, stored directly.
    # The dot is done in 2-D (Mosaic's matmul path wants rank-2 operands); the
    # reshapes only merge/split the leading (sublane-major) dims, the minor dim
    # layout is untouched.
    # TODO(synk): optional bf16 MXU operands (cast xs3 / w here, keep f32 acc)
    # if the module owner accepts ~1e-3 rel error; frees VMEM for bigger tiles.
    out = jnp.dot(xs3.reshape(bt * L, 3 * C), w_ref[...],
                  preferred_element_type=jnp.float32)          # (bt*L, dt)
    o_ref[...] = out.reshape(bt, L, dt).astype(o_ref.dtype)


def _pad8(n):
    return -(-n // 8) * 8


def _pad128(n):
    return -(-n // 128) * 128


def _vmem_block_bytes(bt, L, C, dt, out_itemsize):
    """Padded VMEM footprint of one grid step (f32 compute path)."""
    xb = bt * _pad8(L) * _pad128(C) * 4               # x block (C pads to 128 lanes!)
    wb = _pad8(3 * C) * _pad128(dt) * 4               # resident weight block
    ob = bt * _pad8(L) * _pad128(dt) * out_itemsize   # output block
    xs3 = bt * _pad8(L) * _pad128(3 * C) * 4          # in-kernel im2col temp
    acc = bt * _pad8(L) * _pad128(dt) * 4             # f32 matmul result pre-cast
    # BlockSpec double-buffers the pipelined inputs/outputs; temps are single.
    return 2 * (xb + wb + ob) + xs3 + acc


def _default_b_tile(B, L, C, dt, out_itemsize, budget):
    best = 1
    for bt in range(1, B + 1):
        if B % bt:
            continue
        if B >= 2 and B // bt < 2:
            # Keep >= 2 grid steps on the parallel B axis so both v7x TCs work.
            continue
        if _vmem_block_bytes(bt, L, C, dt, out_itemsize) <= budget:
            best = max(best, bt)
    return best


def token_embedding(x, w, *, b_tile=None, d_tile=None, out_dtype=None,
                    vmem_budget_bytes=28 * 2**20):
    """Circular Conv1d(k=3, no bias), channels-last.

    x: [B, L, C_in], w: [3, C_in, D_model]  ->  [B, L, D_model]
    """
    B, L, C = x.shape
    K, Cw, D = w.shape
    assert K == 3 and Cw == C

    # TODO(synk): downstream-permitting, out_dtype=jnp.bfloat16 halves the
    # dominant HBM traffic (the B*L*D output write); numerics call for the owner.
    out_dtype = x.dtype if out_dtype is None else out_dtype
    out_itemsize = jnp.dtype(out_dtype).itemsize

    # Weight is small (3*C*D); keep it fully resident by default so it is DMA'd
    # exactly once and output stores stay lane-dense (D is a multiple of 128 in
    # real models; if D were tiled, tiles must stay 128-aligned).
    if d_tile is None:
        d_tile = D
    if b_tile is None:
        b_tile = _default_b_tile(B, L, C, d_tile, out_itemsize, vmem_budget_bytes)
    assert B % b_tile == 0 and D % d_tile == 0
    if d_tile != D:
        assert d_tile % 128 == 0, "D tiles must be lane-aligned (multiple of 128)"

    est = _vmem_block_bytes(b_tile, L, C, d_tile, out_itemsize)
    # Explicit scoped-VMEM limit: defaults (16 MiB v5e / 32 MiB v6e+) are hit
    # long before physical VMEM; cap at 64 MiB (v7x physical per-core VMEM).
    vmem_limit = int(min(64 * 2**20, max(16 * 2**20, (3 * est) // 2)))

    # Flatten the taps once at the JAX level: (3, C, D) -> (3*C, D); row k*C + c
    # holds w[k, c, :], matching the [prev, cur, next] channel concat in-kernel.
    w_flat = w.reshape(3 * C, D)

    # Grid: B axis parallel (>= 2 steps when B allows -> megacore sharding on
    # v7x), D axis parallel (trivially 1 with the resident-weight default, so
    # the weight block index is constant and fetched only once).
    grid = (B // b_tile, D // d_tile)
    # TODO(synk): for very long L add an L grid axis; the circular wrap then
    # needs an explicit halo DMA for the first/last L blocks (rows come from the
    # opposite end of the sequence), which a plain 1-row Element halo can't express.
    return pl.pallas_call(
        _token_embedding_kernel,
        out_shape=jax.ShapeDtypeStruct((B, L, D), out_dtype),
        grid=grid,
        in_specs=[
            pl.BlockSpec((b_tile, L, C), lambda i, j: (i, 0, 0)),
            pl.BlockSpec((3 * C, d_tile), lambda i, j: (0, j)),
        ],
        out_specs=pl.BlockSpec((b_tile, L, d_tile), lambda i, j: (i, 0, j)),
        compiler_params=pltpu.CompilerParams(
            dimension_semantics=("parallel", "parallel"),
            vmem_limit_bytes=vmem_limit),
    )(x, w_flat)


def _reference(x, w):
    # Pure-JAX reference of the circular conv (channels-last), highest precision.
    out = 0.0
    for k in range(3):
        xs = jnp.roll(x, shift=1 - k, axis=1)     # xs[:, t] = x[:, (t + k - 1) % L]
        out = out + jnp.einsum("blc,cd->bld", xs, w[k], precision="highest")
    return out


if __name__ == "__main__":
    # Small shapes consistent with the module: batch=2, seq=16, c_in=4.
    # d_model=128 keeps output stores lane-dense (real models use d_model >= 128).
    B, L, C_IN, D_MODEL = 2, 16, 4, 128
    KSIZE = 3

    key = jax.random.PRNGKey(0)
    kx, kw = jax.random.split(key)

    x = jax.random.normal(kx, (B, L, C_IN), dtype=jnp.float32)

    # Kaiming-normal init (fan_in mode, leaky_relu => gain ~= sqrt(2)), deterministic.
    fan_in = C_IN * KSIZE
    std = math.sqrt(2.0) / math.sqrt(fan_in)
    # torch weight shape is [d_model, c_in, k]; we store it as [k, c_in, d_model].
    w = jax.random.normal(kw, (KSIZE, C_IN, D_MODEL), dtype=jnp.float32) * std

    out = token_embedding(x, w)
    out = jax.block_until_ready(out)

    ref = _reference(x, w)
    assert out.shape == (B, L, D_MODEL)
    # Kernel dot uses default matmul precision (multi-pass f32 path in Mosaic);
    # 1e-4 leaves margin vs the precision="highest" reference for this tiny-K conv.
    assert jnp.allclose(out, ref, atol=1e-4, rtol=1e-4)

    print("KERNEL_OK")
</pallas_src>

<mosaic_0001>
module attributes {stable_mosaic.version = 11 : i64} {
  func.func @_token_embedding_kernel(%arg0: i32, %arg1: i32, %arg2: memref<1x16x4xf32, #tpu.memory_space<vmem>>, %arg3: memref<12x128xf32, #tpu.memory_space<vmem>>, %arg4: memref<1x16x128xf32, #tpu.memory_space<vmem>>) attributes {dimension_semantics = [#tpu.dimension_semantics<parallel>, #tpu.dimension_semantics<parallel>], iteration_bounds = array<i64: 2, 1>, scalar_prefetch = 0 : i64, scratch_operands = 0 : i64, tpu.core_type = #tpu.core_type<tc>, window_params = [{transform_indices = @transform_0, window_bounds = array<i64: 1, 16, 4>}, {transform_indices = @transform_1, window_bounds = array<i64: 12, 128>}, {transform_indices = @transform_2, window_bounds = array<i64: 1, 16, 128>}]} {
    %c0 = arith.constant 0 : index
    %c0_0 = arith.constant 0 : index
    %c0_1 = arith.constant 0 : index
    %0 = vector.load %arg2[%c0, %c0_0, %c0_1] : memref<1x16x4xf32, #tpu.memory_space<vmem>>, vector<1x16x4xf32>
    %1 = vector.extract_strided_slice %0 {offsets = [0, 15, 0], sizes = [1, 1, 4], strides = [1, 1, 1]} : vector<1x16x4xf32> to vector<1x1x4xf32>
    %2 = vector.extract_strided_slice %0 {offsets = [0, 0, 0], sizes = [1, 15, 4], strides = [1, 1, 1]} : vector<1x16x4xf32> to vector<1x15x4xf32>
    %3 = tpu.concatenate %1, %2 in 1 : vector<1x1x4xf32>, vector<1x15x4xf32> -> vector<1x16x4xf32>
    %4 = vector.extract_strided_slice %0 {offsets = [0, 1, 0], sizes = [1, 15, 4], strides = [1, 1, 1]} : vector<1x16x4xf32> to vector<1x15x4xf32>
    %5 = vector.extract_strided_slice %0 {offsets = [0, 0, 0], sizes = [1, 1, 4], strides = [1, 1, 1]} : vector<1x16x4xf32> to vector<1x1x4xf32>
    %6 = tpu.concatenate %4, %5 in 1 : vector<1x15x4xf32>, vector<1x1x4xf32> -> vector<1x16x4xf32>
    %7 = tpu.concatenate %3, %0, %6 in 2 : vector<1x16x4xf32>, vector<1x16x4xf32>, vector<1x16x4xf32> -> vector<1x16x12xf32>
    %8 = vector.shape_cast %7 : vector<1x16x12xf32> to vector<16x12xf32>
    %c0_2 = arith.constant 0 : index
    %c0_3 = arith.constant 0 : index
    %9 = vector.load %arg3[%c0_2, %c0_3] : memref<12x128xf32, #tpu.memory_space<vmem>>, vector<12x128xf32>
    %cst = arith.constant dense<0.000000e+00> : vector<16x128xf32>
    %10 = tpu.matmul %8, %9, %cst {dimension_numbers = #tpu.dot_dimension_numbers<[1], [0], [0], [1], [0, 0, 1, 1], [], []>} : vector<16x12xf32>, vector<12x128xf32>, vector<16x128xf32> -> vector<16x128xf32>
    %11 = vector.shape_cast %10 : vector<16x128xf32> to vector<1x16x128xf32>
    %c0_4 = arith.constant 0 : index
    %c0_5 = arith.constant 0 : index
    %c0_6 = arith.constant 0 : index
    %12 = vector.load %arg4[%c0_4, %c0_5, %c0_6] : memref<1x16x128xf32, #tpu.memory_space<vmem>>, vector<1x16x128xf32>
    tpu.vector_store %arg4[%c0_4, %c0_5, %c0_6], %11 {strides = array<i32>} : memref<1x16x128xf32, #tpu.memory_space<vmem>>, vector<1x16x128xf32>,
    return
  }
  func.func @transform_0(%arg0: i32, %arg1: i32) -> (i32, i32, i32) {
    %c0_i32 = arith.constant 0 : i32
    %c0_i32_0 = arith.constant 0 : i32
    %c0_i32_1 = arith.constant 0 : i32
    return %arg0, %c0_i32, %c0_i32_0 : i32, i32, i32
  }
  func.func @transform_1(%arg0: i32, %arg1: i32) -> (i32, i32) {
    %c0_i32 = arith.constant 0 : i32
    %c0_i32_0 = arith.constant 0 : i32
    return %c0_i32, %arg1 : i32, i32
  }
  func.func @transform_2(%arg0: i32, %arg1: i32) -> (i32, i32, i32) {
    %c0_i32 = arith.constant 0 : i32
    %c0_i32_0 = arith.constant 0 : i32
    return %arg0, %c0_i32, %arg1 : i32, i32, i32
  }
}

</mosaic_0001>

<bundles_post_ra>
// kernel: tpu_custom_call.1
= control target key start
LH: loop header
LB: loop body
LE: loop exit
PB: predicated region body
PF: predicated region fallthrough
CT: control target
= control target key end

     0   :  { %7 = vsyncpa [#allocation3], 0  ;;  %s711_s0 = inlined_call_operand.vmem [shape: f32[2,16,4], index: 0, kind: input, shape index: {}]   ;;  %s712_s1 = inlined_call_operand.vmem [shape: f32[12,128], index: 1, kind: input, shape index: {}]   ;;  %s713_s2 = inlined_call_operand.hbm [shape: f32[2,16,128], index: 2, kind: output, shape index: {}]  }
   0x1   :  { %9 = vsyncpa [#allocation3 + $0x1], 0  ;;  %s588_s9 = smov 0   ;;  %s590_s10 = smov 0  }
   0x2   :  { %s592_s11 = smov 0   ;;  %s594_s12 = smov 0  }
   0x3   :  { %s596_s13 = smov 0   ;;  %s598_s14 = smov 0  }
   0x4 LB: > { %s403_s15 = sadd.s32 4294967295, %s567_s14   ;;  %s404_s16 = sadd.s32 4294967294, %s567_s14   ;;  %s567_s14 = sphi %s598_s14, %s15_s14   ;;  %s563_s13 = sphi %s596_s13, %s720_s13   ;;  %s559_s12 = sphi %s594_s12, %s719_s12   ;;  %s555_s11 = sphi %s592_s11, %s718_s11   ;;  %s551_s10 = sphi %s590_s10, %s717_s10   ;;  %s547_s9 = sphi %s588_s9, %s716_s9  }
   0x5   : > { %s27_s17 = sadd.s32 1, %s563_s13  ;;  %s88_s18 = sadd.s32 1, %s555_s11 }
   0x6   : > { %p29_p0 = scmp.ge.s32.totalorder %s27_s17, 2  ;;  %p98_p1 = scmp.ne.s32.totalorder %s555_s11, %s551_s10 }
   0x7   : > { %p99_p2 = scmp.eq.s32.totalorder %s403_s15, 1  ;;  %p104_p3 = scmp.ne.s32.totalorder %s551_s10, %s547_s9 }
   0x8   : > { %s722_s17 = smov (%p29_p0, %s27_s17), 0  ;;  %p105_p5 = scmp.eq.s32.totalorder %s404_s16, 1 }
   0x9   : > { %p628_p4 = por %p99_p2, %p98_p1  ;;  %s83_s20 = ssub.s32 %s563_s13, %s722_s17 }
   0xa   : > { %p408_p6 = scmp.ge.s32.totalorder %s567_s14, 1  ;;  %p86_p7 = scmp.eq.s32.totalorder %s83_s20, 0 }
   0xb   : > { %p635_p8 = por %p105_p5, %p104_p3  ;;  %p138_p9 = scmp.lt.s32.totalorder %s567_s14, 3 }
   0xc   : > { %s641_s22 = scalar_select %p86_p7, %s555_s11, %s88_s18  }
   0xd   : > { %p139_p10 = pnand %p408_p6, %p138_p9 }
   0xe   : > { %p164_p11 = scmp.lt.s32.totalorder (!%p139_p10), %s559_s12, 1  ;;  %s569_s4 = smov (!%p139_p10), 4  }
   0xf   : > { %142 = sbr.rel (%p139_p10) target bundleno = 357 (0x165), region = 28  ;;  %s570_s5 = smov (!%p139_p10), 8  }
  0x10   : > { %s161_s6 = sand.u32 (!%p139_p10), 1, %s551_s10   ;;  %s421_s16 = sshll.u32 (!%p139_p10), %s559_s12, 8 }
  0x11   : > { %s409_s7 = sshll.u32 (!%p139_p10), %s161_s6, 4  ;;  %s663_s23 = scalar_lea.hbm (!%p139_p10), %s713_s2, %s421_s16 }
  0x12   : > { %s163_s8 = scalar_lea.vmem (!%p139_p10), [#allocation2], %s409_s7  ;;  %s665_s24 = scalar_lea.sflag (!%p139_p10), [#allocation3], %s161_s6 }
  0x13   : > { %s316_s15 = sshll.u32 (!%p139_p10), %s163_s8, 4  ;;  %s658_s15 = int_to_ptr.vmem [resolvable:$true] %s316_s15 }
  0x14   : > { %vm220_vm0 = vcmask 1043456   ;;  %v212_v0 = vld [vmem:[%s712_s1 + $0x8] sm:$0xf]  ;;  %v211_v1 = vld [vmem:[%s712_s1] sm:$0xff]  ;;  %s165_s27 = scalar_select %p164_p11, %s559_s12, 1  ;;  %vm185_vm1 = vcmask 1046528  }
  0x15   : > { %426 = vmatprep.subr.msk.mxu0 %vm220_vm0, %v212_v0  ;;  %vm179_vm2 = vcmask 1040384   ;;  %vm205_vm3 = vcmask 31744   ;;  %vm208_vm4 = vcmask 64512   ;;  %vm213_vm5 = vcmask 97280   ;;  %s491_s25 = scalar_lea.vmem %s658_s15, 256  ;;  %s571_s12 = smov [#allocation2]  }
  0x16   : > { %427 = vmatpush3.msk.msra.mxu0 %vm220_vm0, %v212_v0  ;;  %s420_s28 = sshll.u32 %s165_s27, 4  ;;  %p492_p12 = scmp.ne.s32.totalorder %s658_s15, %s491_s25 }
  0x17   : > { %428 = vmatprep.subr.mxu0 %v211_v1  ;;  %s168_s3 = scalar_lea.vmem %s711_s0, %s420_s28  ;;  %s495_s26 = sshll.u32 %s571_s12, 4  ;;  %s496_s26 = int_to_ptr.vmem [resolvable:$false] %s495_s26 }
  0x18   : > { %429 = vmatpush3.msra.mxu0 %v211_v1  ;;  %v173_v2 = vld [vmem:[%s168_s3] sm:$0xff]  ;;  %v174_v3 = vld [vmem:[%s168_s3 + $0x8] sm:$0xff]  ;;  %p493_p13 = pnand %p492_p12, %p628_p4  ;;  %s497_s27 = scalar_lea.vmem %s496_s26, 512 }
  0x19   : > { %v176_v4 = vrot.slane %v174_v3, 7  ;;  %192 = vrot.lane.b32.xlu0 %v173_v2, %s569_s4  ;;  %v180_v5 = vrot.slane %v173_v2, 7  ;;  %v186_v6 = vrot.slane %v173_v2, 1  ;;  %v187_v7 = vrot.slane %v174_v3, 1  ;;  %p498_p1 = scmp.lt.s32.totalorder %s658_s15, %s496_s26  ;;  %p499_p2 = scmp.lt.s32.totalorder %s497_s27, %s491_s25 }
  0x1a   : > { %p494_p0 = pneg %p493_p13 }
  0x1b   : > { %v188_v8 = vsel %vm185_vm1, %v186_v6, %v187_v7  ;;  %v184_v9 = vsel %vm179_vm2, %v176_v4, %v180_v5  ;;  %v181_v10 = vsel %vm179_vm2, %v180_v5, %v176_v4  ;;  %v191_v11 = vsel %vm185_vm1, %v187_v7, %v186_v6  ;;  %p500_p3 = por %p499_p2, %p498_p1 }
  0x1c   : > { %199 = vrot.lane.b32.xlu1 %v188_v8, %s570_s5 }
  0x1d   : > { %194 = vrot.lane.b32.xlu0 %v174_v3, %s569_s4  ;;  %p501_p5 = pnand %p500_p3, %p494_p0 }
  0x20   : > { %201 = vrot.lane.b32.xlu1 %v191_v11, %s570_s5 }
  0x8b   : > { %v193_v12 = vpop.permute.xlu0 %192 }
  0x8c   : > { %v206_v13 = vsel %vm205_vm3, %v184_v9, %v193_v12 }
  0x8e   : > { %v200_v14 = vpop.permute.xlu1 %199 }
  0x8f   : > { %v209_v15 = vsel %vm208_vm4, %v206_v13, %v200_v14  ;;  %v195_v16 = vpop.permute.xlu0 %194 }
  0x90   : > { %430 = vmatprep.mubr.msk.f32.mxu0 %vm213_vm5, %v209_v15  ;;  %v207_v17 = vsel %vm205_vm3, %v181_v10, %v195_v16 }
  0x92   : > { %v202_v18 = vpop.permute.xlu1 %201 }
  0x93   : > { %v210_v19 = vsel %vm208_vm4, %v207_v17, %v202_v18 }
  0x94   : > { %431 = vmatmul.mubr.msk.f32.vlgmr.msra.gmra.mxu0 %vm213_vm5, %v210_v19 }
 0x154   : > { %v432_v20 = vpop.f32.mrf.mxu0 }
 0x155   : > { %300 = vst [vmem:[%s163_s8 + $0x8] sm:$0xff] %v432_v20 }
 0x156   : > { %v290_v21 = vpop.f32.mrf.mxu0 }
 0x157   : > { %299 = vst [vmem:[%s163_s8] sm:$0xff] %v290_v21 }
 0x158   : > { %504 = shalt.err (!%p501_p5)
}
 0x159   : > { %s505_s28 = scalar_lea.hbm %s663_s23, 256  ;;  %s509_s3 = scalar_lea.hbm %s713_s2, 512 }
 0x15a   : > { %p506_p6 = scmp.ne.s32.totalorder %s663_s23, %s505_s28  ;;  %p510_p10 = scmp.lt.s32.totalorder %s663_s23, %s713_s2 }
 0x15b   : > { %p511_p11 = scmp.lt.s32.totalorder %s509_s3, %s505_s28 }
 0x15c   : > { %p507_p7 = pnand %p506_p6, %p628_p4 }
 0x15d   : > { %p512_p12 = por %p511_p11, %p510_p10 }
 0x15e   : > { %p508_p9 = pneg %p507_p7 }
 0x160   : > { %p513_p13 = pnand %p512_p12, %p508_p9 }
 0x162   : > { %516 = shalt.err (!%p513_p13)
}
 0x163   : > { %s572_s7 = smov 128  }
 0x164   : > { %433 = dma.vmem_to_hbm [thread:$0]  (%p628_p4), %s658_s15, 256, %s663_s23, %s665_s24, %s572_s7, %s572_s7, %s570_s5  }
 0x165 PF: > { %p439_p0 = scmp.ge.s32.totalorder %s567_s14, 2  ;;  %s331_s8 = sand.u32 1, %s547_s9  }
 0x166   : > { %s332_s16 = scalar_lea.sflag [#allocation3], %s331_s8 }
 0x167   : > { %p436_p1 = pnand %p439_p0, %p635_p8 }
 0x169   : > { %p437_p2 = pneg %p436_p1 }
 0x16b   : > { %542 = dma.done.wait (%p437_p2), %s332_s16, 256  }
 0x16c   : > { %544 = vsyncadd (%p437_p2), %s332_s16, 4294967040  ;;  %s15_s14 = sadd.s32 1, %s567_s14   ;;  %s716_s9 = smov %s551_s10 }
 0x16d   : > { %p12_p3 = scmp.ge.s32.totalorder %s15_s14, 4   ;;  %s717_s10 = smov %s555_s11 }
 0x16e   : > { %s718_s11 = smov %s641_s22  ;;  %s719_s12 = smov %s563_s13 }
 0x16f   : > { %s720_s13 = smov %s722_s17  ;;  %14 = sbr.rel (!%p12_p3) target bundleno = 4 (0x4), region = 66 }
 0x174   :  { %337 = vsyncpa [#allocation3], 1 }
 0x175   :  { %339 = vsyncpa [#allocation3 + $0x1], 1 }

</bundles_post_ra>
